<compile_context>
chip_gen: v7x
topology: tpu7x:2x2x1
jax: 0.10.0
libtpu: 0.0.40
codegen_flags: <defaults>
</compile_context>

<pallas_src>
import functools

import jax
import jax.numpy as jnp
from jax.experimental import pallas as pl
from jax.experimental.pallas import tpu as pltpu

_MIB = 1024 * 1024


def _round_up(x, m):
    return (x + m - 1) // m * m


def _vmem_capacity_bytes():
    """Per-core VMEM capacity; conservative (v7x-sized) fallback if unknown."""
    try:
        info = pltpu.get_tpu_info()
        cap = getattr(info, "vmem_capacity_bytes", None)
        if cap:
            return int(cap)
    except Exception:
        pass
    return 64 * _MIB


def _vmem_limit_bytes(cap):
    # Leave headroom for compiler-internal scratch; never request all of VMEM.
    return int(max(32 * _MIB, min(cap - 16 * _MIB, 112 * _MIB)))


def _pick_batch_tile(B, hidden, cap):
    """Generation/size-aware default batch tile (multiple of 8 sublanes)."""
    # v5e/v6e (128 MiB VMEM) can afford 1024-row tiles for moderate hidden;
    # v7x (64 MiB) and very large hidden stay at 512.
    max_tile = 1024 if (cap > 80 * _MIB and hidden <= 2048) else 512
    if B <= max_tile:
        # Split small batches into (at least) 2 grid steps so both v7x
        # TensorCores get work and load/compute/store still pipelines.
        return max(8, _round_up(pl.cdiv(B, 2), 8))
    return max_tile


def _value_mlp_kernel(x_ref, w1_ref, b1_ref, w2_ref, b2_ref, w3_ref, b3_ref,
                      o_ref, *, compute_dtype):
    # x: (tb, state_dim); weights pre-cast to compute_dtype (bf16 by default),
    # biases f32. All matmuls accumulate in f32 on the MXU.
    x = x_ref[...].astype(compute_dtype)

    # layer 1: Linear + ReLU
    h1 = jnp.dot(x, w1_ref[...], preferred_element_type=jnp.float32)
    h1 = jnp.maximum(h1 + b1_ref[...], 0.0)                 # (tb, hidden) f32

    # layer 2: Linear + ReLU
    # TODO(synk): for hidden >~ 2900 (bf16 W2 > 16 MiB) add an "arbitrary" K
    # grid axis over W2 with a (tb, hidden) f32 VMEM accumulator so W2 never
    # needs to be fully resident in v7x's 64 MiB VMEM.
    h2 = jnp.dot(h1.astype(compute_dtype), w2_ref[...],
                 preferred_element_type=jnp.float32)
    h2 = jnp.maximum(h2 + b2_ref[...], 0.0)                 # (tb, hidden) f32

    # output layer: Linear(hidden, 1). The (tb, 1) column store is masked but
    # only 4*tb bytes per tile — cheaper than risking an XLU transpose of h2.
    v = jnp.dot(h2.astype(compute_dtype), w3_ref[...],
                preferred_element_type=jnp.float32)          # (tb, 1) f32
    o_ref[...] = (v + b3_ref[...]).astype(o_ref.dtype)


def prepare_value_function_params(params, use_bf16=True):
    """One-time weight prep. Call ONCE (not per forward): casts weights to the
    compute dtype and reshapes biases to 2-D rows, so the per-call hot path
    does no extra HBM passes over the weights."""
    w1, b1, w2, b2, w3, b3 = params
    cd = jnp.bfloat16 if use_bf16 else jnp.float32
    return (
        w1.astype(cd), b1.reshape(1, -1).astype(jnp.float32),
        w2.astype(cd), b2.reshape(1, -1).astype(jnp.float32),
        w3.astype(cd), b3.reshape(1, 1).astype(jnp.float32),
    )


def value_function_forward(state, prepared_params, *, batch_tile=None):
    """ValueFunction forward. state: (B, state_dim) f32 -> (B,) f32.

    `prepared_params` must come from prepare_value_function_params()."""
    w1c, b1r, w2c, b2r, w3c, b3r = prepared_params
    B, state_dim = state.shape
    hidden = w1c.shape[1]
    compute_dtype = w1c.dtype

    cap = _vmem_capacity_bytes()
    tb = batch_tile if batch_tile is not None else _pick_batch_tile(B, hidden, cap)
    assert tb % 8 == 0, "batch_tile must be a multiple of 8 (sublane)"
    # Last tile may be partial: Pallas pads out-of-range input rows (their
    # garbage outputs are dropped on writeback), so no jnp.pad copy is needed.
    n_tiles = pl.cdiv(B, tb)

    kernel = functools.partial(_value_mlp_kernel, compute_dtype=compute_dtype)

    wbytes = jnp.dtype(compute_dtype).itemsize
    n_wparams = state_dim * hidden + hidden * hidden + hidden
    cost = pl.CostEstimate(
        flops=int(2 * B * (state_dim * hidden + hidden * hidden + hidden)),
        transcendentals=0,
        bytes_accessed=int(B * state_dim * 4 + n_wparams * wbytes
                           + (2 * hidden + 1) * 4 + B * 4),
    )

    def _call(single_buffer_weights):
        # Grid-invariant weights/biases: single-buffer them when supported to
        # halve their VMEM residency (matters at large hidden, esp. on v7x).
        wkw = ({"pipeline_mode": pl.Buffered(1)}
               if single_buffer_weights else {})
        in_specs = [
            pl.BlockSpec((tb, state_dim), lambda i: (i, 0)),             # state
            pl.BlockSpec((state_dim, hidden), lambda i: (0, 0), **wkw),  # W1
            pl.BlockSpec((1, hidden), lambda i: (0, 0), **wkw),          # b1
            pl.BlockSpec((hidden, hidden), lambda i: (0, 0), **wkw),     # W2
            pl.BlockSpec((1, hidden), lambda i: (0, 0), **wkw),          # b2
            pl.BlockSpec((hidden, 1), lambda i: (0, 0), **wkw),          # W3
            pl.BlockSpec((1, 1), lambda i: (0, 0), **wkw),               # b3
        ]
        return pl.pallas_call(
            kernel,
            out_shape=jax.ShapeDtypeStruct((B, 1), state.dtype),
            grid=(n_tiles,),
            in_specs=in_specs,
            out_specs=pl.BlockSpec((tb, 1), lambda i: (i, 0)),
            compiler_params=pltpu.CompilerParams(
                dimension_semantics=("parallel",),
                vmem_limit_bytes=_vmem_limit_bytes(cap)),
            cost_estimate=cost,
        )(state, w1c, b1r, w2c, b2r, w3c, b3r)

    try:
        out = _call(single_buffer_weights=True)
    except Exception:
        # This jax/Mosaic version does not accept pipeline_mode=pl.Buffered(1)
        # on top-level pallas_call BlockSpecs; use default double buffering.
        out = _call(single_buffer_weights=False)

    return out[:, 0]


def init_value_function_params(key, state_dim, hidden_dim):
    """Deterministic init mimicking PyTorch Linear default U(-1/sqrt(fan_in))."""
    ks = jax.random.split(key, 6)

    def linear(kw, kb, fan_in, fan_out):
        bound = 1.0 / jnp.sqrt(jnp.float32(fan_in))
        # stored as (in, out) so the kernel computes x @ W
        w = jax.random.uniform(kw, (fan_in, fan_out), jnp.float32, -bound, bound)
        b = jax.random.uniform(kb, (fan_out,), jnp.float32, -bound, bound)
        return w, b

    w1, b1 = linear(ks[0], ks[1], state_dim, hidden_dim)
    w2, b2 = linear(ks[2], ks[3], hidden_dim, hidden_dim)
    w3, b3 = linear(ks[4], ks[5], hidden_dim, 1)
    return (w1, b1, w2, b2, w3, b3)


def value_function_reference(state, params, use_bf16=True):
    """Pure-JAX reference matching the kernel's matmul dtype / f32-accum math."""
    w1, b1, w2, b2, w3, b3 = params
    cd = jnp.bfloat16 if use_bf16 else jnp.float32
    h1 = jnp.maximum(
        jnp.dot(state.astype(cd), w1.astype(cd),
                preferred_element_type=jnp.float32) + b1, 0.0)
    h2 = jnp.maximum(
        jnp.dot(h1.astype(cd), w2.astype(cd),
                preferred_element_type=jnp.float32) + b2, 0.0)
    v = jnp.dot(h2.astype(cd), w3.astype(cd),
                preferred_element_type=jnp.float32) + b3
    return v[:, 0]


if __name__ == "__main__":
    key = jax.random.PRNGKey(0)
    k_params, k_state = jax.random.split(key)

    # small shapes consistent with ValueFunction(state_dim, hidden_dim, n_hidden=2)
    batch, state_dim, hidden_dim = 8, 16, 32

    params = init_value_function_params(k_params, state_dim, hidden_dim)
    state = jax.random.normal(k_state, (batch, state_dim), jnp.float32)

    # One-time weight preparation (hoisted out of the per-call hot path).
    prepared_bf16 = prepare_value_function_params(params, use_bf16=True)

    out = jax.block_until_ready(value_function_forward(state, prepared_bf16))
    ref = value_function_reference(state, params, use_bf16=True)
    assert out.shape == (batch,), out.shape
    assert jnp.allclose(out, ref, atol=1e-3, rtol=1e-3), (out, ref)

    # Ragged batch: exercises the partial last tile (no jnp.pad copy).
    batch2 = 10
    state2 = jax.random.normal(jax.random.PRNGKey(1), (batch2, state_dim),
                               jnp.float32)
    out2 = jax.block_until_ready(value_function_forward(state2, prepared_bf16))
    ref2 = value_function_reference(state2, params, use_bf16=True)
    assert out2.shape == (batch2,), out2.shape
    assert jnp.allclose(out2, ref2, atol=1e-3, rtol=1e-3), (out2, ref2)

    # Exact-f32 path (matches the all-f32 PyTorch module's numerics).
    prepared_f32 = prepare_value_function_params(params, use_bf16=False)
    out3 = jax.block_until_ready(value_function_forward(state, prepared_f32))
    ref3 = value_function_reference(state, params, use_bf16=False)
    assert jnp.allclose(out3, ref3, atol=1e-5, rtol=1e-5), (out3, ref3)

    print("KERNEL_OK")
</pallas_src>

<mosaic_0001>
module attributes {stable_mosaic.version = 11 : i64} {
  func.func @_value_mlp_kernel(%arg0: i32, %arg1: memref<8x16xf32, #tpu.memory_space<vmem>>, %arg2: memref<16x32xbf16, #tpu.memory_space<vmem>>, %arg3: memref<1x32xf32, #tpu.memory_space<vmem>>, %arg4: memref<32x32xbf16, #tpu.memory_space<vmem>>, %arg5: memref<1x32xf32, #tpu.memory_space<vmem>>, %arg6: memref<32x1xbf16, #tpu.memory_space<vmem>>, %arg7: memref<1x1xf32, #tpu.memory_space<vmem>>, %arg8: memref<8x1xf32, #tpu.memory_space<vmem>>) attributes {dimension_semantics = [#tpu.dimension_semantics<parallel>], iteration_bounds = array<i64: 1>, scalar_prefetch = 0 : i64, scratch_operands = 0 : i64, tpu.core_type = #tpu.core_type<tc>, window_params = [{transform_indices = @transform_0, window_bounds = array<i64: 8, 16>}, {pipeline_mode = #tpu.pipeline_mode<synchronous>, transform_indices = @transform_1, window_bounds = array<i64: 16, 32>}, {pipeline_mode = #tpu.pipeline_mode<synchronous>, transform_indices = @transform_2, window_bounds = array<i64: 1, 32>}, {pipeline_mode = #tpu.pipeline_mode<synchronous>, transform_indices = @transform_3, window_bounds = array<i64: 32, 32>}, {pipeline_mode = #tpu.pipeline_mode<synchronous>, transform_indices = @transform_4, window_bounds = array<i64: 1, 32>}, {pipeline_mode = #tpu.pipeline_mode<synchronous>, transform_indices = @transform_5, window_bounds = array<i64: 32, 1>}, {pipeline_mode = #tpu.pipeline_mode<synchronous>, transform_indices = @transform_6, window_bounds = array<i64: 1, 1>}, {transform_indices = @transform_7, window_bounds = array<i64: 8, 1>}]} {
    %c0 = arith.constant 0 : index
    %c0_0 = arith.constant 0 : index
    %0 = vector.load %arg1[%c0, %c0_0] : memref<8x16xf32, #tpu.memory_space<vmem>>, vector<8x16xf32>
    %1 = arith.truncf %0 : vector<8x16xf32> to vector<8x16xbf16>
    %c0_1 = arith.constant 0 : index
    %c0_2 = arith.constant 0 : index
    %2 = vector.load %arg2[%c0_1, %c0_2] : memref<16x32xbf16, #tpu.memory_space<vmem>>, vector<16x32xbf16>
    %cst = arith.constant dense<0.000000e+00> : vector<8x32xf32>
    %3 = tpu.matmul %1, %2, %cst {dimension_numbers = #tpu.dot_dimension_numbers<[1], [0], [0], [1], [0, 0, 1, 1], [], []>} : vector<8x16xbf16>, vector<16x32xbf16>, vector<8x32xf32> -> vector<8x32xf32>
    %c0_3 = arith.constant 0 : index
    %c0_4 = arith.constant 0 : index
    %4 = vector.load %arg3[%c0_3, %c0_4] : memref<1x32xf32, #tpu.memory_space<vmem>>, vector<1x32xf32>
    %5 = vector.broadcast %4 : vector<1x32xf32> to vector<8x32xf32>
    %6 = arith.addf %3, %5 : vector<8x32xf32>
    %cst_5 = arith.constant 0.000000e+00 : f32
    %7 = vector.broadcast %cst_5 : f32 to vector<8x32xf32>
    %8 = arith.maximumf %6, %7 : vector<8x32xf32>
    %9 = arith.truncf %8 : vector<8x32xf32> to vector<8x32xbf16>
    %c0_6 = arith.constant 0 : index
    %c0_7 = arith.constant 0 : index
    %10 = vector.load %arg4[%c0_6, %c0_7] : memref<32x32xbf16, #tpu.memory_space<vmem>>, vector<32x32xbf16>
    %cst_8 = arith.constant dense<0.000000e+00> : vector<8x32xf32>
    %11 = tpu.matmul %9, %10, %cst_8 {dimension_numbers = #tpu.dot_dimension_numbers<[1], [0], [0], [1], [0, 0, 1, 1], [], []>} : vector<8x32xbf16>, vector<32x32xbf16>, vector<8x32xf32> -> vector<8x32xf32>
    %c0_9 = arith.constant 0 : index
    %c0_10 = arith.constant 0 : index
    %12 = vector.load %arg5[%c0_9, %c0_10] : memref<1x32xf32, #tpu.memory_space<vmem>>, vector<1x32xf32>
    %13 = vector.broadcast %12 : vector<1x32xf32> to vector<8x32xf32>
    %14 = arith.addf %11, %13 : vector<8x32xf32>
    %cst_11 = arith.constant 0.000000e+00 : f32
    %15 = vector.broadcast %cst_11 : f32 to vector<8x32xf32>
    %16 = arith.maximumf %14, %15 : vector<8x32xf32>
    %17 = arith.truncf %16 : vector<8x32xf32> to vector<8x32xbf16>
    %c0_12 = arith.constant 0 : index
    %c0_13 = arith.constant 0 : index
    %18 = vector.load %arg6[%c0_12, %c0_13] : memref<32x1xbf16, #tpu.memory_space<vmem>>, vector<32x1xbf16>
    %cst_14 = arith.constant dense<0.000000e+00> : vector<8x1xf32>
    %19 = tpu.matmul %17, %18, %cst_14 {dimension_numbers = #tpu.dot_dimension_numbers<[1], [0], [0], [1], [0, 0, 1, 1], [], []>} : vector<8x32xbf16>, vector<32x1xbf16>, vector<8x1xf32> -> vector<8x1xf32>
    %c0_15 = arith.constant 0 : index
    %c0_16 = arith.constant 0 : index
    %20 = vector.load %arg7[%c0_15, %c0_16] : memref<1x1xf32, #tpu.memory_space<vmem>>, vector<1x1xf32>
    %21 = vector.broadcast %20 : vector<1x1xf32> to vector<8x1xf32>
    %22 = arith.addf %19, %21 : vector<8x1xf32>
    %c0_17 = arith.constant 0 : index
    %c0_18 = arith.constant 0 : index
    %23 = vector.load %arg8[%c0_17, %c0_18] : memref<8x1xf32, #tpu.memory_space<vmem>>, vector<8x1xf32>
    tpu.vector_store %arg8[%c0_17, %c0_18], %22 {strides = array<i32>} : memref<8x1xf32, #tpu.memory_space<vmem>>, vector<8x1xf32>,
    return
  }
  func.func @transform_0(%arg0: i32) -> (i32, i32) {
    %c0_i32 = arith.constant 0 : i32
    %c0_i32_0 = arith.constant 0 : i32
    return %arg0, %c0_i32 : i32, i32
  }
  func.func @transform_1(%arg0: i32) -> (i32, i32) {
    %c0_i32 = arith.constant 0 : i32
    %c0_i32_0 = arith.constant 0 : i32
    %c0_i32_1 = arith.constant 0 : i32
    return %c0_i32, %c0_i32_0 : i32, i32
  }
  func.func @transform_2(%arg0: i32) -> (i32, i32) {
    %c0_i32 = arith.constant 0 : i32
    %c0_i32_0 = arith.constant 0 : i32
    %c0_i32_1 = arith.constant 0 : i32
    return %c0_i32, %c0_i32_0 : i32, i32
  }
  func.func @transform_3(%arg0: i32) -> (i32, i32) {
    %c0_i32 = arith.constant 0 : i32
    %c0_i32_0 = arith.constant 0 : i32
    %c0_i32_1 = arith.constant 0 : i32
    return %c0_i32, %c0_i32_0 : i32, i32
  }
  func.func @transform_4(%arg0: i32) -> (i32, i32) {
    %c0_i32 = arith.constant 0 : i32
    %c0_i32_0 = arith.constant 0 : i32
    %c0_i32_1 = arith.constant 0 : i32
    return %c0_i32, %c0_i32_0 : i32, i32
  }
  func.func @transform_5(%arg0: i32) -> (i32, i32) {
    %c0_i32 = arith.constant 0 : i32
    %c0_i32_0 = arith.constant 0 : i32
    %c0_i32_1 = arith.constant 0 : i32
    return %c0_i32, %c0_i32_0 : i32, i32
  }
  func.func @transform_6(%arg0: i32) -> (i32, i32) {
    %c0_i32 = arith.constant 0 : i32
    %c0_i32_0 = arith.constant 0 : i32
    %c0_i32_1 = arith.constant 0 : i32
    return %c0_i32, %c0_i32_0 : i32, i32
  }
  func.func @transform_7(%arg0: i32) -> (i32, i32) {
    %c0_i32 = arith.constant 0 : i32
    %c0_i32_0 = arith.constant 0 : i32
    return %arg0, %c0_i32 : i32, i32
  }
}

module attributes {stable_mosaic.version = 11 : i64} {
  func.func @_value_mlp_kernel(%arg0: i32, %arg1: memref<8x16xf32, #tpu.memory_space<vmem>>, %arg2: memref<16x32xbf16, #tpu.memory_space<vmem>>, %arg3: memref<1x32xf32, #tpu.memory_space<vmem>>, %arg4: memref<32x32xbf16, #tpu.memory_space<vmem>>, %arg5: memref<1x32xf32, #tpu.memory_space<vmem>>, %arg6: memref<32x1xbf16, #tpu.memory_space<vmem>>, %arg7: memref<1x1xf32, #tpu.memory_space<vmem>>, %arg8: memref<8x1xf32, #tpu.memory_space<vmem>>) attributes {dimension_semantics = [#tpu.dimension_semantics<parallel>], iteration_bounds = array<i64: 1>, scalar_prefetch = 0 : i64, scratch_operands = 0 : i64, tpu.core_type = #tpu.core_type<tc>, window_params = [{transform_indices = @transform_0, window_bounds = array<i64: 8, 16>}, {pipeline_mode = #tpu.pipeline_mode<synchronous>, transform_indices = @transform_1, window_bounds = array<i64: 16, 32>}, {pipeline_mode = #tpu.pipeline_mode<synchronous>, transform_indices = @transform_2, window_bounds = array<i64: 1, 32>}, {pipeline_mode = #tpu.pipeline_mode<synchronous>, transform_indices = @transform_3, window_bounds = array<i64: 32, 32>}, {pipeline_mode = #tpu.pipeline_mode<synchronous>, transform_indices = @transform_4, window_bounds = array<i64: 1, 32>}, {pipeline_mode = #tpu.pipeline_mode<synchronous>, transform_indices = @transform_5, window_bounds = array<i64: 32, 1>}, {pipeline_mode = #tpu.pipeline_mode<synchronous>, transform_indices = @transform_6, window_bounds = array<i64: 1, 1>}, {transform_indices = @transform_7, window_bounds = array<i64: 8, 1>}]} {
    %c0 = arith.constant 0 : index
    %c0_0 = arith.constant 0 : index
    %0 = vector.load %arg1[%c0, %c0_0] : memref<8x16xf32, #tpu.memory_space<vmem>>, vector<8x16xf32>
    %1 = arith.truncf %0 : vector<8x16xf32> to vector<8x16xbf16>
    %c0_1 = arith.constant 0 : index
    %c0_2 = arith.constant 0 : index
    %2 = vector.load %arg2[%c0_1, %c0_2] : memref<16x32xbf16, #tpu.memory_space<vmem>>, vector<16x32xbf16>
    %cst = arith.constant dense<0.000000e+00> : vector<8x32xf32>
    %3 = tpu.matmul %1, %2, %cst {dimension_numbers = #tpu.dot_dimension_numbers<[1], [0], [0], [1], [0, 0, 1, 1], [], []>} : vector<8x16xbf16>, vector<16x32xbf16>, vector<8x32xf32> -> vector<8x32xf32>
    %c0_3 = arith.constant 0 : index
    %c0_4 = arith.constant 0 : index
    %4 = vector.load %arg3[%c0_3, %c0_4] : memref<1x32xf32, #tpu.memory_space<vmem>>, vector<1x32xf32>
    %5 = vector.broadcast %4 : vector<1x32xf32> to vector<8x32xf32>
    %6 = arith.addf %3, %5 : vector<8x32xf32>
    %cst_5 = arith.constant 0.000000e+00 : f32
    %7 = vector.broadcast %cst_5 : f32 to vector<8x32xf32>
    %8 = arith.maximumf %6, %7 : vector<8x32xf32>
    %9 = arith.truncf %8 : vector<8x32xf32> to vector<8x32xbf16>
    %c0_6 = arith.constant 0 : index
    %c0_7 = arith.constant 0 : index
    %10 = vector.load %arg4[%c0_6, %c0_7] : memref<32x32xbf16, #tpu.memory_space<vmem>>, vector<32x32xbf16>
    %cst_8 = arith.constant dense<0.000000e+00> : vector<8x32xf32>
    %11 = tpu.matmul %9, %10, %cst_8 {dimension_numbers = #tpu.dot_dimension_numbers<[1], [0], [0], [1], [0, 0, 1, 1], [], []>} : vector<8x32xbf16>, vector<32x32xbf16>, vector<8x32xf32> -> vector<8x32xf32>
    %c0_9 = arith.constant 0 : index
    %c0_10 = arith.constant 0 : index
    %12 = vector.load %arg5[%c0_9, %c0_10] : memref<1x32xf32, #tpu.memory_space<vmem>>, vector<1x32xf32>
    %13 = vector.broadcast %12 : vector<1x32xf32> to vector<8x32xf32>
    %14 = arith.addf %11, %13 : vector<8x32xf32>
    %cst_11 = arith.constant 0.000000e+00 : f32
    %15 = vector.broadcast %cst_11 : f32 to vector<8x32xf32>
    %16 = arith.maximumf %14, %15 : vector<8x32xf32>
    %17 = arith.truncf %16 : vector<8x32xf32> to vector<8x32xbf16>
    %c0_12 = arith.constant 0 : index
    %c0_13 = arith.constant 0 : index
    %18 = vector.load %arg6[%c0_12, %c0_13] : memref<32x1xbf16, #tpu.memory_space<vmem>>, vector<32x1xbf16>
    %cst_14 = arith.constant dense<0.000000e+00> : vector<8x1xf32>
    %19 = tpu.matmul %17, %18, %cst_14 {dimension_numbers = #tpu.dot_dimension_numbers<[1], [0], [0], [1], [0, 0, 1, 1], [], []>} : vector<8x32xbf16>, vector<32x1xbf16>, vector<8x1xf32> -> vector<8x1xf32>
    %c0_15 = arith.constant 0 : index
    %c0_16 = arith.constant 0 : index
    %20 = vector.load %arg7[%c0_15, %c0_16] : memref<1x1xf32, #tpu.memory_space<vmem>>, vector<1x1xf32>
    %21 = vector.broadcast %20 : vector<1x1xf32> to vector<8x1xf32>
    %22 = arith.addf %19, %21 : vector<8x1xf32>
    %c0_17 = arith.constant 0 : index
    %c0_18 = arith.constant 0 : index
    %23 = vector.load %arg8[%c0_17, %c0_18] : memref<8x1xf32, #tpu.memory_space<vmem>>, vector<8x1xf32>
    tpu.vector_store %arg8[%c0_17, %c0_18], %22 {strides = array<i32>} : memref<8x1xf32, #tpu.memory_space<vmem>>, vector<8x1xf32>,
    return
  }
  func.func @transform_0(%arg0: i32) -> (i32, i32) {
    %c0_i32 = arith.constant 0 : i32
    %c0_i32_0 = arith.constant 0 : i32
    return %arg0, %c0_i32 : i32, i32
  }
  func.func @transform_1(%arg0: i32) -> (i32, i32) {
    %c0_i32 = arith.constant 0 : i32
    %c0_i32_0 = arith.constant 0 : i32
    %c0_i32_1 = arith.constant 0 : i32
    return %c0_i32, %c0_i32_0 : i32, i32
  }
  func.func @transform_2(%arg0: i32) -> (i32, i32) {
    %c0_i32 = arith.constant 0 : i32
    %c0_i32_0 = arith.constant 0 : i32
    %c0_i32_1 = arith.constant 0 : i32
    return %c0_i32, %c0_i32_0 : i32, i32
  }
  func.func @transform_3(%arg0: i32) -> (i32, i32) {
    %c0_i32 = arith.constant 0 : i32
    %c0_i32_0 = arith.constant 0 : i32
    %c0_i32_1 = arith.constant 0 : i32
    return %c0_i32, %c0_i32_0 : i32, i32
  }
  func.func @transform_4(%arg0: i32) -> (i32, i32) {
    %c0_i32 = arith.constant 0 : i32
    %c0_i32_0 = arith.constant 0 : i32
    %c0_i32_1 = arith.constant 0 : i32
    return %c0_i32, %c0_i32_0 : i32, i32
  }
  func.func @transform_5(%arg0: i32) -> (i32, i32) {
    %c0_i32 = arith.constant 0 : i32
    %c0_i32_0 = arith.constant 0 : i32
    %c0_i32_1 = arith.constant 0 : i32
    return %c0_i32, %c0_i32_0 : i32, i32
  }
  func.func @transform_6(%arg0: i32) -> (i32, i32) {
    %c0_i32 = arith.constant 0 : i32
    %c0_i32_0 = arith.constant 0 : i32
    %c0_i32_1 = arith.constant 0 : i32
    return %c0_i32, %c0_i32_0 : i32, i32
  }
  func.func @transform_7(%arg0: i32) -> (i32, i32) {
    %c0_i32 = arith.constant 0 : i32
    %c0_i32_0 = arith.constant 0 : i32
    return %arg0, %c0_i32 : i32, i32
  }
}

</mosaic_0001>

<bundles_post_ra>
// kernel: tpu_custom_call.1
= control target key start
LH: loop header
LB: loop body
LE: loop exit
PB: predicated region body
PF: predicated region fallthrough
CT: control target
= control target key end

     0   :  { %s401_s0 = inlined_call_operand.vmem [shape: f32[8,16], index: 0, kind: input, shape index: {}]   ;;  %s402_s1 = inlined_call_operand.vmem [shape: bf16[16,32], index: 1, kind: input, shape index: {}]   ;;  %s403_s2 = inlined_call_operand.hbm [shape: f32[1,32], index: 2, kind: input, shape index: {}]   ;;  %s404_s3 = inlined_call_operand.vmem [shape: bf16[32,32], index: 3, kind: input, shape index: {}]   ;;  %s405_s4 = inlined_call_operand.vmem [shape: f32[1,32], index: 4, kind: input, shape index: {}]   ;;  %s406_s5 = inlined_call_operand.vmem [shape: bf16[32,1], index: 5, kind: input, shape index: {}]   ;;  %s407_s6 = inlined_call_operand.<no memory space> [shape: f32[1,1], index: 6, kind: input, shape index: {}]   ;;  %s408_s7 = inlined_call_operand.vmem [shape: f32[8,1], index: 7, kind: output, shape index: {}]  }
   0x1   :  { %v12_v0 = vstv %s407_s6 }
   0x2   :  { %13 = vst [vmem:[#allocation2] sm:$0x1] %v12_v0 }
   0x3   :  { %14 = vsyncpa [#allocation4], 0  ;;  %s319_s26 = smov [#allocation3]   ;;  %s295_s30 = scalar_lea.hbm %s403_s2, 16 }
   0x4   :  { %s25_s27 = sshll.u32 %s319_s26, 4  ;;  %p296_p0 = scmp.ne.s32.totalorder %s403_s2, %s295_s30  ;;  %s26_s27 = int_to_ptr.vmem [resolvable:$true] %s25_s27 }
   0x5   :  { %p299_p1 = scmp.lt.u32.totalorder %s295_s30, %s403_s2 }
   0x7   :  { %p301_p2 = pnand %p299_p1, %p296_p0 }
   0x9   :  { %304 = shalt.err (!%p301_p2)
}
   0xa   :  { %s305_s6 = scalar_lea.vmem %s26_s27, 16  ;;  %s309_s12 = scalar_lea.vmem %s26_s27, 32 }
   0xb   :  { %p306_p3 = scmp.ne.s32.totalorder %s26_s27, %s305_s6  ;;  %p310_p4 = scmp.lt.s32.totalorder %s26_s27, %s26_s27 }
   0xc   :  { %p311_p5 = scmp.lt.s32.totalorder %s309_s12, %s305_s6 }
   0xe   :  { %p312_p6 = por %p311_p5, %p310_p4 }
  0x10   :  { %p313_p7 = pnand %p312_p6, %p306_p3 }
  0x12   :  { %316 = shalt.err (!%p313_p7)
}
  0x13   :  { %28 = dma.hbm_to_vmem [thread:$0]  %s403_s2, 16, %s26_s27, [#allocation4]  }
  0x14   :  { %317 = dma.done.wait [#allocation4], 16  }
  0x15   :  { %318 = vsyncadd [#allocation4], 4294967280  ;;  %v320_v1 = vmov 0.0   ;;  %vm321_vm0 = vmmov 0   ;;  %v290_v2 = vld [vmem:[%s402_s1] sm:$0xff]   ;;  %vm58_vm1 = vcmask 130048  }
  0x16   :  { %265 = vmatprep.subr.bf16.mxu0 %v320_v1  ;;  %267 = vmatprep.mubr.msk.bf16.mxu0 %vm321_vm0, %v320_v1  ;;  %v41_v3 = vld [vmem:[%s401_s0] sm:$0xff]  ;;  %v292_v6 = vld [vmem:[%s404_s3 + $0x8] sm:$0xff]   ;;  %vm127_vm2 = vcmask 261120   ;;  %vm239_vm3 = vcmask 7168  }
  0x17   :  { %271 = vmatprep.subr.bf16.mxu1 %v320_v1  ;;  %275 = vmatprep.mubr.msk.bf16.mxu1 %vm321_vm0, %v320_v1  ;;  %v42_v4 = vpack.c.bf16 %v41_v3, %v41_v3  ;;  %v291_v5 = vld [vmem:[%s404_s3] sm:$0xff]   ;;  %v294_v16 = vld [vmem:[%s406_s5 + $0x8] sm:$0xff]  }
  0x18   :  { %266 = vmatpush3.bf16.msra.mxu0 %v290_v2  ;;  %272 = vmatpush3.bf16.msra.mxu1 %v291_v5  ;;  %v293_v7 = vld [vmem:[%s406_s5] sm:$0xff]  }
  0x19   :  { %279 = vmatprep.subr.bf16.mxu0 %v320_v1  ;;  %273 = vmatprep.subr.bf16.mxu1 %v320_v1  ;;  %v246_v8 = vld [vmem:[#allocation3] ss:$0 sm:$0xff]  ;;  %v249_v17 = vld [vmem:[%s405_s4] ss:$0 sm:$0xff] }
  0x1a   :  { %v253_v25 = vld [vmem:[#allocation2] ss:$0 sm:$0xff] }
  0x1b   :  { %268 = vmatmul.mubr.msk.bf16.vlgmr.msra.gmra.mrb[0].mxu0 %vm58_vm1, %v42_v4 }
  0x1c   :  { %283 = vmatprep.mubr.msk.bf16.mxu0 %vm321_vm0, %v320_v1  ;;  %274 = vmatpush3.bf16.msra.mxu1 %v292_v6 }
  0x1d   :  { %280 = vmatpush3.bf16.msra.mxu0 %v293_v7 }
  0x1e   :  { %281 = vmatprep.subr.bf16.mxu0 %v320_v1 }
  0x21   :  { %282 = vmatpush3.bf16.msra.mxu0 %v294_v16 }
  0xee   :  { %v96_v9 = vpop.f32.mrb[0].mxu0 }
  0xef   :  { %v97_v10 = vadd.f32 %v246_v8, %v96_v9  ;;  %v269_v11 = vpop.f32.mrb[1].mxu0 }
  0xf0   :  { %v99_v12 = vpop.f32.mrb[2].mxu0 }
  0xf1   :  { %v102_v13 = vmax.f32 %v97_v10, 0.0  ;;  %v270_v14 = vpop.f32.mrb[3].mxu0 }
  0xf3   :  { %v103_v15 = vpack.c.bf16 %v102_v13, %v102_v13 }
  0xf5   :  { %276 = vmatmul.mubr.msk.bf16.vlgmr.msra.gmra.mrb[0].mxu1 %vm127_vm2, %v103_v15 }
 0x1c8   :  { %v165_v18 = vpop.f32.mrb[0].mxu1 }
 0x1c9   :  { %v166_v19 = vadd.f32 %v249_v17, %v165_v18  ;;  %v277_v20 = vpop.f32.mrb[1].mxu1 }
 0x1ca   :  { %v168_v21 = vpop.f32.mrb[2].mxu1 }
 0x1cb   :  { %v171_v22 = vmax.f32 %v166_v19, 0.0  ;;  %v278_v23 = vpop.f32.mrb[3].mxu1 }
 0x1cd   :  { %v172_v24 = vpack.c.bf16 %v171_v22, %v171_v22 }
 0x1cf   :  { %284 = vmatmul.mubr.msk.bf16.vlgmr.msra.gmra.mrb[4].mxu0 %vm127_vm2, %v172_v24 }
 0x2a2   :  { %v233_v26 = vpop.f32.mrb[4].mxu0 }
 0x2a3   :  { %v234_v27 = vadd.f32 %v253_v25, %v233_v26  ;;  %v285_v28 = vpop.f32.mrb[5].mxu0 }
 0x2a4   :  { %v236_v29 = vpop.f32.mrb[6].mxu0 }
 0x2a5   :  { %240 = vst.msk [vmem:[%s408_s7] sm:$0xff] %vm239_vm3, %v234_v27  ;;  %v286_v30 = vpop.f32.mrb[7].mxu0 }
 0x2a6   :  { %245 = vsyncpa [#allocation4], 1 }

// kernel: tpu_custom_call.1
= control target key start
LH: loop header
LB: loop body
LE: loop exit
PB: predicated region body
PF: predicated region fallthrough
CT: control target
= control target key end

     0   :  { %s401_s0 = inlined_call_operand.vmem [shape: f32[8,16], index: 0, kind: input, shape index: {}]   ;;  %s402_s1 = inlined_call_operand.vmem [shape: bf16[16,32], index: 1, kind: input, shape index: {}]   ;;  %s403_s2 = inlined_call_operand.hbm [shape: f32[1,32], index: 2, kind: input, shape index: {}]   ;;  %s404_s3 = inlined_call_operand.vmem [shape: bf16[32,32], index: 3, kind: input, shape index: {}]   ;;  %s405_s4 = inlined_call_operand.vmem [shape: f32[1,32], index: 4, kind: input, shape index: {}]   ;;  %s406_s5 = inlined_call_operand.vmem [shape: bf16[32,1], index: 5, kind: input, shape index: {}]   ;;  %s407_s6 = inlined_call_operand.<no memory space> [shape: f32[1,1], index: 6, kind: input, shape index: {}]   ;;  %s408_s7 = inlined_call_operand.vmem [shape: f32[8,1], index: 7, kind: output, shape index: {}]  }
   0x1   :  { %v12_v0 = vstv %s407_s6 }
   0x2   :  { %13 = vst [vmem:[#allocation2] sm:$0x1] %v12_v0 }
   0x3   :  { %14 = vsyncpa [#allocation4], 0  ;;  %s319_s26 = smov [#allocation3]   ;;  %s295_s30 = scalar_lea.hbm %s403_s2, 16 }
   0x4   :  { %s25_s27 = sshll.u32 %s319_s26, 4  ;;  %p296_p0 = scmp.ne.s32.totalorder %s403_s2, %s295_s30  ;;  %s26_s27 = int_to_ptr.vmem [resolvable:$true] %s25_s27 }
   0x5   :  { %p299_p1 = scmp.lt.u32.totalorder %s295_s30, %s403_s2 }
   0x7   :  { %p301_p2 = pnand %p299_p1, %p296_p0 }
   0x9   :  { %304 = shalt.err (!%p301_p2)
}
   0xa   :  { %s305_s6 = scalar_lea.vmem %s26_s27, 16  ;;  %s309_s12 = scalar_lea.vmem %s26_s27, 32 }
   0xb   :  { %p306_p3 = scmp.ne.s32.totalorder %s26_s27, %s305_s6  ;;  %p310_p4 = scmp.lt.s32.totalorder %s26_s27, %s26_s27 }
   0xc   :  { %p311_p5 = scmp.lt.s32.totalorder %s309_s12, %s305_s6 }
   0xe   :  { %p312_p6 = por %p311_p5, %p310_p4 }
  0x10   :  { %p313_p7 = pnand %p312_p6, %p306_p3 }
  0x12   :  { %316 = shalt.err (!%p313_p7)
}
  0x13   :  { %28 = dma.hbm_to_vmem [thread:$0]  %s403_s2, 16, %s26_s27, [#allocation4]  }
  0x14   :  { %317 = dma.done.wait [#allocation4], 16  }
  0x15   :  { %318 = vsyncadd [#allocation4], 4294967280  ;;  %v320_v1 = vmov 0.0   ;;  %vm321_vm0 = vmmov 0   ;;  %v290_v2 = vld [vmem:[%s402_s1] sm:$0xff]   ;;  %vm58_vm1 = vcmask 130048  }
  0x16   :  { %265 = vmatprep.subr.bf16.mxu0 %v320_v1  ;;  %267 = vmatprep.mubr.msk.bf16.mxu0 %vm321_vm0, %v320_v1  ;;  %v41_v3 = vld [vmem:[%s401_s0] sm:$0xff]  ;;  %v292_v6 = vld [vmem:[%s404_s3 + $0x8] sm:$0xff]   ;;  %vm127_vm2 = vcmask 261120   ;;  %vm239_vm3 = vcmask 7168  }
  0x17   :  { %271 = vmatprep.subr.bf16.mxu1 %v320_v1  ;;  %275 = vmatprep.mubr.msk.bf16.mxu1 %vm321_vm0, %v320_v1  ;;  %v42_v4 = vpack.c.bf16 %v41_v3, %v41_v3  ;;  %v291_v5 = vld [vmem:[%s404_s3] sm:$0xff]   ;;  %v294_v16 = vld [vmem:[%s406_s5 + $0x8] sm:$0xff]  }
  0x18   :  { %266 = vmatpush3.bf16.msra.mxu0 %v290_v2  ;;  %272 = vmatpush3.bf16.msra.mxu1 %v291_v5  ;;  %v293_v7 = vld [vmem:[%s406_s5] sm:$0xff]  }
  0x19   :  { %279 = vmatprep.subr.bf16.mxu0 %v320_v1  ;;  %273 = vmatprep.subr.bf16.mxu1 %v320_v1  ;;  %v246_v8 = vld [vmem:[#allocation3] ss:$0 sm:$0xff]  ;;  %v249_v17 = vld [vmem:[%s405_s4] ss:$0 sm:$0xff] }
  0x1a   :  { %v253_v25 = vld [vmem:[#allocation2] ss:$0 sm:$0xff] }
  0x1b   :  { %268 = vmatmul.mubr.msk.bf16.vlgmr.msra.gmra.mrb[0].mxu0 %vm58_vm1, %v42_v4 }
  0x1c   :  { %283 = vmatprep.mubr.msk.bf16.mxu0 %vm321_vm0, %v320_v1  ;;  %274 = vmatpush3.bf16.msra.mxu1 %v292_v6 }
  0x1d   :  { %280 = vmatpush3.bf16.msra.mxu0 %v293_v7 }
  0x1e   :  { %281 = vmatprep.subr.bf16.mxu0 %v320_v1 }
  0x21   :  { %282 = vmatpush3.bf16.msra.mxu0 %v294_v16 }
  0xee   :  { %v96_v9 = vpop.f32.mrb[0].mxu0 }
  0xef   :  { %v97_v10 = vadd.f32 %v246_v8, %v96_v9  ;;  %v269_v11 = vpop.f32.mrb[1].mxu0 }
  0xf0   :  { %v99_v12 = vpop.f32.mrb[2].mxu0 }
  0xf1   :  { %v102_v13 = vmax.f32 %v97_v10, 0.0  ;;  %v270_v14 = vpop.f32.mrb[3].mxu0 }
  0xf3   :  { %v103_v15 = vpack.c.bf16 %v102_v13, %v102_v13 }
  0xf5   :  { %276 = vmatmul.mubr.msk.bf16.vlgmr.msra.gmra.mrb[0].mxu1 %vm127_vm2, %v103_v15 }
 0x1c8   :  { %v165_v18 = vpop.f32.mrb[0].mxu1 }
 0x1c9   :  { %v166_v19 = vadd.f32 %v249_v17, %v165_v18  ;;  %v277_v20 = vpop.f32.mrb[1].mxu1 }
 0x1ca   :  { %v168_v21 = vpop.f32.mrb[2].mxu1 }
 0x1cb   :  { %v171_v22 = vmax.f32 %v166_v19, 0.0  ;;  %v278_v23 = vpop.f32.mrb[3].mxu1 }
 0x1cd   :  { %v172_v24 = vpack.c.bf16 %v171_v22, %v171_v22 }
 0x1cf   :  { %284 = vmatmul.mubr.msk.bf16.vlgmr.msra.gmra.mrb[4].mxu0 %vm127_vm2, %v172_v24 }
 0x2a2   :  { %v233_v26 = vpop.f32.mrb[4].mxu0 }
 0x2a3   :  { %v234_v27 = vadd.f32 %v253_v25, %v233_v26  ;;  %v285_v28 = vpop.f32.mrb[5].mxu0 }
 0x2a4   :  { %v236_v29 = vpop.f32.mrb[6].mxu0 }
 0x2a5   :  { %240 = vst.msk [vmem:[%s408_s7] sm:$0xff] %vm239_vm3, %v234_v27  ;;  %v286_v30 = vpop.f32.mrb[7].mxu0 }
 0x2a6   :  { %245 = vsyncpa [#allocation4], 1 }

</bundles_post_ra>
